<compile_context>
chip_gen: v6e
topology: v6e:2x2x1
jax: 0.10.0
libtpu: 0.0.40
codegen_flags: <defaults>
</compile_context>

<pallas_src>
import jax
import jax.numpy as jnp
from jax.experimental import pallas as pl
from jax.experimental.pallas import tpu as pltpu

# Normalization constants from Network3.__init__
MEAN = (123.675, 116.28, 103.53)
STD = (58.395, 57.12, 57.375)


# ---------------------------------------------------------------------------
# Fused kernel: seg_map[k, t] = b_eff[k] + sum_c x[c, t] * w_eff[k, c]
# (normalization already folded into w_eff / b_eff on the host)
# layout: x block (1, C, T)  -- spatial pixels on lanes (lane-dense)
#         o block (1, K, T)  -- spatial pixels on lanes (lane-dense stores)
#         w_eff  (K, C), b_eff (K, 1) -- tiny, replicated across the grid
# ---------------------------------------------------------------------------
def _fused_norm_seghead_kernel(x_ref, w_ref, b_ref, o_ref):
    x = x_ref[0]          # (C, T)  raw input pixels
    w = w_ref[...]        # (K, C)  normalization-folded weights
    # VPU broadcast FMAs: (1, T) * (K, 1) -> (K, T); unrolled over C at trace time.
    acc = b_ref[...] + x[0:1, :] * w[:, 0:1]
    for c in range(1, x.shape[0]):
        acc = acc + x[c:c + 1, :] * w[:, c:c + 1]
    o_ref[0] = acc


def _pick_lane_tile(hw, target=32768):
    """Largest multiple-of-128 divisor of hw that is <= target (or hw itself)."""
    if hw % 128 != 0:
        # TODO(synk): handle ragged spatial sizes with pl.cdiv + a masked tail
        # instead of a single full-width block (which also serializes v7x's TCs).
        return hw
    if hw <= target:
        return hw
    best, t = 128, 128
    while t <= target:
        if hw % t == 0:
            best = t
        t += 128
    return best


def fused_norm_seg_head(x_nchw, weight, bias):
    """(x*255, first-3-channel ImageNet normalize) -> 1x1-conv C->K, all in one pass."""
    B, C, H, W = x_nchw.shape
    K = weight.shape[1]
    HW = H * W
    x3 = x_nchw.reshape(B, C, HW).astype(jnp.float32)

    # Fold normalization into the projection (channels >= 3 only get the *255).
    scale = jnp.array([255.0 / STD[i] if i < 3 else 255.0 for i in range(C)], jnp.float32)
    offset = jnp.array([-MEAN[i] / STD[i] if i < 3 else 0.0 for i in range(C)], jnp.float32)
    w = weight.astype(jnp.float32)                      # (C, K)
    b = bias.reshape(-1).astype(jnp.float32)            # (K,)
    w_eff = (w * scale[:, None]).T                      # (K, C)
    b_eff = (b + offset @ w).reshape(K, 1)              # (K, 1)

    lane_tile = _pick_lane_tile(HW)
    grid = (B, HW // lane_tile)

    out = pl.pallas_call(
        _fused_norm_seghead_kernel,
        out_shape=jax.ShapeDtypeStruct((B, K, HW), jnp.float32),
        grid_spec=pltpu.PrefetchScalarGridSpec(
            num_scalar_prefetch=0,
            grid=grid,
            in_specs=[
                pl.BlockSpec((1, C, lane_tile), lambda bi, j: (bi, 0, j)),
                pl.BlockSpec((K, C), lambda bi, j: (0, 0)),
                pl.BlockSpec((K, 1), lambda bi, j: (0, 0)),
            ],
            out_specs=pl.BlockSpec((1, K, lane_tile), lambda bi, j: (bi, 0, j)),
        ),
        compiler_params=pltpu.CompilerParams(
            dimension_semantics=("parallel", "parallel")),
    )(x3, w_eff, b_eff)
    return out.reshape(B, K, H, W)


# ---------------------------------------------------------------------------
# Network3.forward
# ---------------------------------------------------------------------------
def network3_forward(fused_seg1, params):
    # TODO(synk): WeTr (mix-transformer encoder + SegFormer head) is not defined
    # in the provided source; denoise_net is replaced by a deterministic
    # pointwise C -> num_classes projection fused with the normalization.
    seg_map = fused_norm_seg_head(fused_seg1, params["w"], params["b"])
    return fused_seg1, fused_seg1, seg_map


if __name__ == "__main__":
    B, C, H, W = 2, 4, 16, 16       # channel 3 exercises the "only *255" path
    NUM_CLASSES = 8

    key = jax.random.PRNGKey(0)
    kx, kw, kb = jax.random.split(key, 3)
    x = jax.random.uniform(kx, (B, C, H, W), jnp.float32)            # image in [0, 1]
    params = {
        "w": jax.random.normal(kw, (C, NUM_CLASSES), jnp.float32) * 0.02,
        "b": jax.random.normal(kb, (NUM_CLASSES,), jnp.float32) * 0.02,
    }

    out1, out2, seg_map = jax.jit(network3_forward)(x, params)
    jax.block_until_ready((out1, out2, seg_map))

    # Reference in plain JAX, computed in the original (unfused) order.
    norm_ref = x * 255.0
    mean3 = jnp.array(MEAN, jnp.float32).reshape(1, 3, 1, 1)
    std3 = jnp.array(STD, jnp.float32).reshape(1, 3, 1, 1)
    norm_ref = norm_ref.at[:, :3].set((norm_ref[:, :3] - mean3) / std3)
    seg_ref = (jnp.einsum("bchw,ck->bkhw", norm_ref, params["w"])
               + params["b"].reshape(1, NUM_CLASSES, 1, 1))

    assert out1.shape == x.shape and out2.shape == x.shape
    assert seg_map.shape == (B, NUM_CLASSES, H, W)
    assert jnp.allclose(out1, x) and jnp.allclose(out2, x)
    assert jnp.allclose(seg_map, seg_ref, atol=1e-3, rtol=1e-3)

    print("KERNEL_OK")
</pallas_src>

<mosaic_0001>
module attributes {stable_mosaic.version = 11 : i64} {
  func.func @_fused_norm_seghead_kernel(%arg0: i32, %arg1: i32, %arg2: memref<1x4x256xf32, #tpu.memory_space<vmem>>, %arg3: memref<8x4xf32, #tpu.memory_space<vmem>>, %arg4: memref<8x1xf32, #tpu.memory_space<vmem>>, %arg5: memref<1x8x256xf32, #tpu.memory_space<vmem>>) attributes {dimension_semantics = [#tpu.dimension_semantics<parallel>, #tpu.dimension_semantics<parallel>], iteration_bounds = array<i64: 2, 1>, scalar_prefetch = 0 : i64, scratch_operands = 0 : i64, tpu.core_type = #tpu.core_type<tc>, window_params = [{transform_indices = @transform_0, window_bounds = array<i64: 1, 4, 256>}, {pipeline_mode = #tpu.pipeline_mode<synchronous>, transform_indices = @transform_1, window_bounds = array<i64: 8, 4>}, {pipeline_mode = #tpu.pipeline_mode<synchronous>, transform_indices = @transform_2, window_bounds = array<i64: 8, 1>}, {transform_indices = @transform_3, window_bounds = array<i64: 1, 8, 256>}]} {
    %c0 = arith.constant 0 : index
    %c0_0 = arith.constant 0 : index
    %c0_1 = arith.constant 0 : index
    %0 = vector.load %arg2[%c0, %c0_0, %c0_1] : memref<1x4x256xf32, #tpu.memory_space<vmem>>, vector<1x4x256xf32>
    %1 = vector.shape_cast %0 : vector<1x4x256xf32> to vector<4x256xf32>
    %c0_2 = arith.constant 0 : index
    %c0_3 = arith.constant 0 : index
    %2 = vector.load %arg3[%c0_2, %c0_3] : memref<8x4xf32, #tpu.memory_space<vmem>>, vector<8x4xf32>
    %c0_4 = arith.constant 0 : index
    %c0_5 = arith.constant 0 : index
    %3 = vector.load %arg4[%c0_4, %c0_5] : memref<8x1xf32, #tpu.memory_space<vmem>>, vector<8x1xf32>
    %4 = vector.extract_strided_slice %1 {offsets = [0, 0], sizes = [1, 256], strides = [1, 1]} : vector<4x256xf32> to vector<1x256xf32>
    %5 = vector.extract_strided_slice %2 {offsets = [0, 0], sizes = [8, 1], strides = [1, 1]} : vector<8x4xf32> to vector<8x1xf32>
    %6 = vector.broadcast %4 : vector<1x256xf32> to vector<8x256xf32>
    %7 = vector.broadcast %5 : vector<8x1xf32> to vector<8x256xf32>
    %8 = arith.mulf %6, %7 : vector<8x256xf32>
    %9 = vector.broadcast %3 : vector<8x1xf32> to vector<8x256xf32>
    %10 = arith.addf %9, %8 : vector<8x256xf32>
    %11 = vector.extract_strided_slice %1 {offsets = [1, 0], sizes = [1, 256], strides = [1, 1]} : vector<4x256xf32> to vector<1x256xf32>
    %12 = vector.extract_strided_slice %2 {offsets = [0, 1], sizes = [8, 1], strides = [1, 1]} : vector<8x4xf32> to vector<8x1xf32>
    %13 = vector.broadcast %11 : vector<1x256xf32> to vector<8x256xf32>
    %14 = vector.broadcast %12 : vector<8x1xf32> to vector<8x256xf32>
    %15 = arith.mulf %13, %14 : vector<8x256xf32>
    %16 = arith.addf %10, %15 : vector<8x256xf32>
    %17 = vector.extract_strided_slice %1 {offsets = [2, 0], sizes = [1, 256], strides = [1, 1]} : vector<4x256xf32> to vector<1x256xf32>
    %18 = vector.extract_strided_slice %2 {offsets = [0, 2], sizes = [8, 1], strides = [1, 1]} : vector<8x4xf32> to vector<8x1xf32>
    %19 = vector.broadcast %17 : vector<1x256xf32> to vector<8x256xf32>
    %20 = vector.broadcast %18 : vector<8x1xf32> to vector<8x256xf32>
    %21 = arith.mulf %19, %20 : vector<8x256xf32>
    %22 = arith.addf %16, %21 : vector<8x256xf32>
    %23 = vector.extract_strided_slice %1 {offsets = [3, 0], sizes = [1, 256], strides = [1, 1]} : vector<4x256xf32> to vector<1x256xf32>
    %24 = vector.extract_strided_slice %2 {offsets = [0, 3], sizes = [8, 1], strides = [1, 1]} : vector<8x4xf32> to vector<8x1xf32>
    %25 = vector.broadcast %23 : vector<1x256xf32> to vector<8x256xf32>
    %26 = vector.broadcast %24 : vector<8x1xf32> to vector<8x256xf32>
    %27 = arith.mulf %25, %26 : vector<8x256xf32>
    %28 = arith.addf %22, %27 : vector<8x256xf32>
    %c0_6 = arith.constant 0 : index
    %c0_7 = arith.constant 0 : index
    %c0_8 = arith.constant 0 : index
    %29 = vector.load %arg5[%c0_6, %c0_7, %c0_8] : memref<1x8x256xf32, #tpu.memory_space<vmem>>, vector<1x8x256xf32>
    %30 = vector.shape_cast %29 : vector<1x8x256xf32> to vector<8x256xf32>
    %31 = vector.shape_cast %28 : vector<8x256xf32> to vector<1x8x256xf32>
    tpu.vector_store %arg5[%c0_6, %c0_7, %c0_8], %31 {strides = array<i32>} : memref<1x8x256xf32, #tpu.memory_space<vmem>>, vector<1x8x256xf32>,
    return
  }
  func.func @transform_0(%arg0: i32, %arg1: i32) -> (i32, i32, i32) {
    %c0_i32 = arith.constant 0 : i32
    %c0_i32_0 = arith.constant 0 : i32
    return %arg0, %c0_i32, %arg1 : i32, i32, i32
  }
  func.func @transform_1(%arg0: i32, %arg1: i32) -> (i32, i32) {
    %c0_i32 = arith.constant 0 : i32
    %c0_i32_0 = arith.constant 0 : i32
    %c0_i32_1 = arith.constant 0 : i32
    return %c0_i32, %c0_i32_0 : i32, i32
  }
  func.func @transform_2(%arg0: i32, %arg1: i32) -> (i32, i32) {
    %c0_i32 = arith.constant 0 : i32
    %c0_i32_0 = arith.constant 0 : i32
    %c0_i32_1 = arith.constant 0 : i32
    return %c0_i32, %c0_i32_0 : i32, i32
  }
  func.func @transform_3(%arg0: i32, %arg1: i32) -> (i32, i32, i32) {
    %c0_i32 = arith.constant 0 : i32
    %c0_i32_0 = arith.constant 0 : i32
    return %arg0, %c0_i32, %arg1 : i32, i32, i32
  }
}

</mosaic_0001>

<bundles_post_ra>
// kernel: network3_forward.1
= control target key start
LH: loop header
LB: loop body
LE: loop exit
PB: predicated region body
PF: predicated region fallthrough
CT: control target
= control target key end

     0   :  { %s506_s12 = smov 0   ;;  %s508_s13 = smov 0   ;;  %s549_s0 = inlined_call_operand.vmem [shape: f32[2,4,256], index: 0, kind: input, shape index: {}]   ;;  %s550_s1 = inlined_call_operand.vmem [shape: f32[8,4], index: 1, kind: input, shape index: {}]   ;;  %s551_s2 = inlined_call_operand.vmem [shape: f32[8,1], index: 2, kind: input, shape index: {}]   ;;  %s552_s3 = inlined_call_operand.vmem [shape: f32[2,8,256], index: 3, kind: output, shape index: {}]  }
   0x1   :  { %s510_s14 = smov 0  }
   0x2 LB: > { %s25_s15 = sadd.s32 1, %s476_s13  ;;  %p417_p0 = scmp.ge.s32.totalorder %s480_s14, 1  ;;  %s480_s14 = sphi %s510_s14, %s13_s14   ;;  %s476_s13 = sphi %s508_s13, %s554_s13   ;;  %s472_s12 = sphi %s506_s12, %s553_s12  }
   0x3   : > { %p27_p1 = scmp.ge.s32.totalorder %s25_s15, 2  ;;  %p158_p2 = scmp.lt.s32.totalorder %s480_s14, 3 }
   0x5   : > { %s556_s15 = smov (%p27_p1, %s25_s15), 0  ;;  %p159_p3 = pnand %p417_p0, %p158_p2 }
   0x6   : > { %p191_p4 = scmp.lt.s32.totalorder (!%p159_p3), %s472_s12, 1 }
   0x7   : > { %162 = sbr.rel (%p159_p3) target bundleno = 152 (0x98), region = 32 }
   0xc   : > { %v211_v0 = vld [vmem:[%s550_s1] sm:$0xff]  ;;  %v482_v1 = vmov 0   ;;  %v483_v2 = vmov 1   ;;  %v484_v4 = vmov 2   ;;  %v485_v5 = vmov 3   ;;  %s558_s12 = smov (!%p191_p4, %s472_s12), 1 }
   0xd   : > { %454 = vset.pattern.permute.xlu0 %v482_v1  ;;  %455 = vset.pattern.permute.xlu1 %v483_v2  ;;  %v212_v3 = vld [vmem:[%s551_s2] sm:$0xff]  ;;  %v214_v6 = vlaneseq  ;;  %s424_s20 = sshll.u32 %s558_s12, 3  ;;  %s425_s24 = sshll.u32 %s558_s12, 4 }
   0xe   : > { %234 = vperm.xlu0 %454, %v211_v0   ;;  %265 = vperm.xlu1 %455, %v211_v0   ;;  %s198_s23 = scalar_lea.vmem %s549_s0, %s424_s20  ;;  %s208_s27 = scalar_lea.vmem %s552_s3, %s425_s24 }
   0xf   : > { %v215_v7 = vshrl.u32 %v214_v6, 7  ;;  %v210_v10 = vld [vmem:[%s198_s23] sm:$0xff] }
  0x11   : > { %v216_v8 = vsub.s32 0, %v215_v7  ;;  %v220_v9 = vsub.s32 4, %v215_v7  ;;  %v248_v11 = vsub.s32 1, %v215_v7  ;;  %v252_v12 = vsub.s32 5, %v215_v7 }
  0x12   : > { %241 = vperm.xlu0 %454, %v212_v3   ;;  %456 = vset.pattern.permute.xlu1 %v484_v4  ;;  %v274_v13 = vsub.s32 2, %v215_v7  ;;  %v278_v14 = vsub.s32 6, %v215_v7  ;;  %v300_v21 = vsub.s32 3, %v215_v7  ;;  %v304_v22 = vsub.s32 7, %v215_v7 }
  0x13   : > { %291 = vperm.xlu1 %456, %v211_v0   ;;  %v217_v15 = vrot.slane %v210_v10, %v216_v8  ;;  %v221_v16 = vrot.slane %v210_v10, %v220_v9  ;;  %v249_v17 = vrot.slane %v210_v10, %v248_v11  ;;  %v253_v18 = vrot.slane %v210_v10, %v252_v12 }
  0x14   : > { %v275_v19 = vrot.slane %v210_v10, %v274_v13  ;;  %v279_v20 = vrot.slane %v210_v10, %v278_v14  ;;  %v301_v31 = vrot.slane %v210_v10, %v300_v21  ;;  %v305_v32 = vrot.slane %v210_v10, %v304_v22 }
  0x15   : > { %v227_v23 = vrot.slane %v217_v15, %v216_v8  ;;  %v231_v24 = vrot.slane %v221_v16, %v216_v8  ;;  %v259_v27 = vrot.slane %v249_v17, %v248_v11  ;;  %v263_v28 = vrot.slane %v253_v18, %v248_v11 }
  0x16   : > { %457 = vset.pattern.permute.xlu0 %v485_v5  ;;  %v285_v29 = vrot.slane %v275_v19, %v274_v13  ;;  %v289_v30 = vrot.slane %v279_v20, %v274_v13  ;;  %v311_v43 = vrot.slane %v301_v31, %v300_v21  ;;  %v315_v44 = vrot.slane %v305_v32, %v300_v21 }
  0x17   : > { %317 = vperm.xlu0 %457, %v211_v0  }
  0x89   : > { %v235_v25 = vpop.permute.xlu0 %234  ;;  %v266_v26 = vpop.permute.xlu1 %265 }
  0x8a   : > { %v237_v33 = vmul.f32 %v235_v25, %v227_v23  ;;  %v238_v34 = vmul.f32 %v235_v25, %v231_v24  ;;  %v268_v36 = vmul.f32 %v266_v26, %v259_v27  ;;  %v269_v37 = vmul.f32 %v266_v26, %v263_v28 }
  0x8d   : > { %v242_v35 = vpop.permute.xlu0 %241 }
  0x8e   : > { %v244_v38 = vadd.f32 %v242_v35, %v237_v33  ;;  %v245_v39 = vadd.f32 %v242_v35, %v238_v34  ;;  %v292_v40 = vpop.permute.xlu1 %291 }
  0x8f   : > { %v294_v41 = vmul.f32 %v292_v40, %v285_v29  ;;  %v295_v42 = vmul.f32 %v292_v40, %v289_v30 }
  0x90   : > { %v270_v45 = vadd.f32 %v268_v36, %v244_v38  ;;  %v271_v46 = vadd.f32 %v269_v37, %v245_v39 }
  0x92   : > { %v296_v47 = vadd.f32 %v294_v41, %v270_v45  ;;  %v297_v48 = vadd.f32 %v295_v42, %v271_v46  ;;  %v318_v49 = vpop.permute.xlu0 %317 }
  0x93   : > { %v320_v50 = vmul.f32 %v318_v49, %v311_v43  ;;  %v321_v51 = vmul.f32 %v318_v49, %v315_v44 }
  0x95   : > { %v322_v52 = vadd.f32 %v320_v50, %v296_v47  ;;  %v323_v53 = vadd.f32 %v321_v51, %v297_v48 }
  0x97   : > { %324 = vst [vmem:[%s208_s27] sm:$0xff] %v322_v52  ;;  %325 = vst [vmem:[%s208_s27 + $0x8] sm:$0xff] %v323_v53 }
  0x98 PF: > { %s13_s14 = sadd.s32 1, %s480_s14   ;;  %s553_s12 = smov %s476_s13 }
  0x99   : > { %p10_p5 = scmp.ge.s32.totalorder %s13_s14, 4   ;;  %s554_s13 = smov %s556_s15 }
  0x9b   :  { %12 = sbr.rel (!%p10_p5) target bundleno = 2 (0x2), region = 62 }

</bundles_post_ra>
